<compile_context>
chip_gen: v7x
topology: tpu7x:2x2x1
jax: 0.10.0
libtpu: 0.0.40
codegen_flags: <defaults>
</compile_context>

<pallas_src>
import functools

import jax
import jax.numpy as jnp
from jax.experimental import pallas as pl
from jax.experimental.pallas import tpu as pltpu


def _fused_mlp_kernel(x_ref, *refs, num_layers: int, precision):
    """Fused MLP forward for one batch tile.

    x_ref : [TB, In]                          (VMEM; bf16 on the low-precision path)
    refs  : w0 [In,H], b0 [1,H], ..., w_{L-2} [H,H], b_{L-2} [1,H],   (VMEM, resident)
            w_last_row [1, H_last]            (VMEM, f32),
            b_last     [1, 1]                 (SMEM scalar, f32),
            o_ref      [1, TB]                (VMEM, lane-dense output row)
    """
    o_ref = refs[-1]
    b_last_ref = refs[-2]
    w_last_row_ref = refs[-3]
    wb = refs[:-3]

    h = x_ref[...]

    # Hidden layers: MXU matmul with f32 accumulation; bias add + ReLU on the VPU in f32.
    for i in range(num_layers - 1):
        w = wb[2 * i][...]
        b = wb[2 * i + 1][...]
        lhs = h if h.dtype == w.dtype else h.astype(w.dtype)
        h = jnp.dot(lhs, w, preferred_element_type=jnp.float32, precision=precision) + b
        h = jnp.maximum(h, 0.0)

    # Final Out=1 layer, produced lane-dense:  y[0, r] = sum_k h[r, k] * w_last[k].
    # One (1,H) x (H,TB) MXU pass; the h transpose uses the otherwise-idle XLU and the
    # store is a single unmasked lane-dense write instead of TB/8 masked 1-lane stores.
    h32 = h.astype(jnp.float32)
    y = jnp.dot(w_last_row_ref[...], h32.T,
                preferred_element_type=jnp.float32, precision=precision)
    y = y + b_last_ref[0, 0]
    o_ref[...] = y.astype(o_ref.dtype)


def _round_up(x, m):
    return ((x + m - 1) // m) * m


def linear_regressor_forward(x, params, *, batch_tile: int = 512, use_bf16: bool = False):
    """Fused forward pass: Linear->ReLU on all layers except the last (identity).

    params: list of (w_t [in, out], b [1, out]) per layer (weights pre-transposed);
            the last layer must have out == 1.
    """
    batch, in_feats = x.shape
    n_layers = len(params)
    assert batch_tile % 8 == 0, "batch_tile must be a multiple of 8 sublanes"

    # Last layer re-expressed as a lane-dense row vector + scalar bias.
    w_last, b_last = params[-1]
    assert w_last.shape[1] == 1, "last layer must have a single output feature"
    w_last_row = w_last.reshape(1, w_last.shape[0]).astype(jnp.float32)
    b_last = b_last.reshape(1, 1).astype(jnp.float32)

    hidden = params[:-1]
    if use_bf16:
        # bf16 operands / f32 accumulation: fast MXU path on v6e/v7x, half the HBM/VMEM
        # traffic.  Biases, ReLU and the final projection stay in f32.
        x = x.astype(jnp.bfloat16)
        hidden = [(w.astype(jnp.bfloat16), b.astype(jnp.float32)) for (w, b) in hidden]
        precision = jax.lax.Precision.DEFAULT
    else:
        precision = jax.lax.Precision.HIGHEST  # match torch f32 numerics

    # Batch tiling — no jnp.pad: the ragged last block is handled by Pallas and rows are
    # independent, so garbage tail rows only yield tail outputs that get sliced off.
    if batch < 16:
        tb = batch                                   # single full-batch block
    elif batch <= 2 * batch_tile:
        tb = _round_up(-(-batch // 2), 8)            # >= 2 tiles: feed both v7x TCs
    else:
        tb = batch_tile
    num_tiles = -(-batch // tb)
    grid = (num_tiles,)

    # x is batch-tiled; every weight/bias uses a full-array block with a constant
    # index_map, so it stays resident in VMEM across the whole batch grid loop.
    inputs = [x]
    in_specs = [pl.BlockSpec((tb, in_feats), lambda i: (i, 0))]
    for (w_t, b) in hidden:
        inputs += [w_t, b]
        in_specs += [
            pl.BlockSpec(w_t.shape, lambda i: (0, 0)),
            pl.BlockSpec(b.shape, lambda i: (0, 0)),
        ]
    inputs += [w_last_row, b_last]
    in_specs += [
        pl.BlockSpec(w_last_row.shape, lambda i: (0, 0)),
        pl.BlockSpec(memory_space=pltpu.MemorySpace.SMEM),   # scalar last-layer bias
    ]

    kernel = functools.partial(_fused_mlp_kernel, num_layers=n_layers, precision=precision)

    out_rows = pl.pallas_call(
        kernel,
        out_shape=jax.ShapeDtypeStruct((num_tiles, tb), jnp.float32),
        grid=grid,
        in_specs=in_specs,
        out_specs=pl.BlockSpec((1, tb), lambda i: (i, 0)),    # lane-dense per-tile row
        compiler_params=pltpu.CompilerParams(
            dimension_semantics=("parallel",),                # shard batch tiles on v7x
        ),
    )(*inputs)

    # (num_tiles, tb) row-major matches global row order; drop any ragged tail rows.
    return out_rows.reshape(-1)[:batch].reshape(batch, 1)


def init_linear_regressor_params(key, num_layers, in_feats, hidden_feats):
    """Params matching torch nn.Linear init (U[-1/sqrt(in), 1/sqrt(in)]).

    Returns list of (w_t [in, out], b [1, out]) per layer (weights pre-transposed).
    """
    if num_layers == 1:
        dims = [(in_feats, 1)]
    else:
        dims = [(in_feats, hidden_feats)]
        dims += [(hidden_feats, hidden_feats)] * (num_layers - 2)
        dims += [(hidden_feats, 1)]

    params = []
    for (fan_in, fan_out) in dims:
        key, kw, kb = jax.random.split(key, 3)
        bound = 1.0 / jnp.sqrt(jnp.float32(fan_in))
        w_t = jax.random.uniform(kw, (fan_in, fan_out), jnp.float32, -bound, bound)
        b = jax.random.uniform(kb, (1, fan_out), jnp.float32, -bound, bound)
        params.append((w_t, b))
    return params


def _reference_forward(x, params):
    t = x
    n = len(params)
    for i, (w_t, b) in enumerate(params):
        t = t @ w_t + b
        if i < n - 1:
            t = jnp.maximum(t, 0.0)
    return t


if __name__ == "__main__":
    key = jax.random.PRNGKey(0)
    k_in, k_params, k_in2, k_params1 = jax.random.split(key, 4)

    # --- main check: batch=8, 3-layer MLP (16 -> 32 -> 32 -> 1), single fused call ---
    batch, in_feats, hidden_feats, num_layers = 8, 16, 32, 3
    x = jax.random.normal(k_in, (batch, in_feats), dtype=jnp.float32)
    params = init_linear_regressor_params(k_params, num_layers, in_feats, hidden_feats)

    out = jax.block_until_ready(linear_regressor_forward(x, params))
    ref = _reference_forward(x, params)
    assert out.shape == (batch, 1), out.shape
    assert jnp.allclose(out, ref, atol=1e-5, rtol=1e-5), "mismatch vs reference (fused)"

    # --- ragged multi-tile path (no pad copy): batch=20 -> tb=16, grid=(2,) ---
    x2 = jax.random.normal(k_in2, (20, in_feats), dtype=jnp.float32)
    out2 = jax.block_until_ready(linear_regressor_forward(x2, params))
    ref2 = _reference_forward(x2, params)
    assert out2.shape == (20, 1), out2.shape
    assert jnp.allclose(out2, ref2, atol=1e-5, rtol=1e-5), "mismatch vs reference (tiled)"

    # --- num_layers == 1 edge case: single Linear(in, 1) with identity activation ---
    params1 = init_linear_regressor_params(k_params1, 1, in_feats, hidden_feats)
    out1 = jax.block_until_ready(linear_regressor_forward(x, params1))
    ref1 = _reference_forward(x, params1)
    assert out1.shape == (batch, 1), out1.shape
    assert jnp.allclose(out1, ref1, atol=1e-5, rtol=1e-5), "mismatch vs reference (1 layer)"

    # --- bf16-operand / f32-accumulate path (v6e/v7x fast MXU); looser tolerance ---
    outb = jax.block_until_ready(linear_regressor_forward(x, params, use_bf16=True))
    assert outb.shape == (batch, 1), outb.shape
    assert jnp.allclose(outb, ref, atol=5e-2, rtol=5e-2), "mismatch vs reference (bf16)"

    print("KERNEL_OK")
</pallas_src>

<mosaic_0001>
module attributes {stable_mosaic.version = 11 : i64} {
  func.func @_fused_mlp_kernel(%arg0: i32, %arg1: memref<8x16xf32, #tpu.memory_space<vmem>>, %arg2: memref<16x32xf32, #tpu.memory_space<vmem>>, %arg3: memref<1x32xf32, #tpu.memory_space<vmem>>, %arg4: memref<32x32xf32, #tpu.memory_space<vmem>>, %arg5: memref<1x32xf32, #tpu.memory_space<vmem>>, %arg6: memref<1x32xf32, #tpu.memory_space<vmem>>, %arg7: memref<1x1xf32, #tpu.memory_space<smem>>, %arg8: memref<1x8xf32, #tpu.memory_space<vmem>>) attributes {dimension_semantics = [#tpu.dimension_semantics<parallel>], iteration_bounds = array<i64: 1>, scalar_prefetch = 0 : i64, scratch_operands = 0 : i64, tpu.core_type = #tpu.core_type<tc>, window_params = [{transform_indices = @transform_0, window_bounds = array<i64: 8, 16>}, {pipeline_mode = #tpu.pipeline_mode<synchronous>, transform_indices = @transform_1, window_bounds = array<i64: 16, 32>}, {pipeline_mode = #tpu.pipeline_mode<synchronous>, transform_indices = @transform_2, window_bounds = array<i64: 1, 32>}, {pipeline_mode = #tpu.pipeline_mode<synchronous>, transform_indices = @transform_3, window_bounds = array<i64: 32, 32>}, {pipeline_mode = #tpu.pipeline_mode<synchronous>, transform_indices = @transform_4, window_bounds = array<i64: 1, 32>}, {pipeline_mode = #tpu.pipeline_mode<synchronous>, transform_indices = @transform_5, window_bounds = array<i64: 1, 32>}, {transform_indices = @transform_6, window_bounds = array<i64: 1, 1>}, {transform_indices = @transform_7, window_bounds = array<i64: 1, 8>}]} {
    %c0 = arith.constant 0 : index
    %c0_0 = arith.constant 0 : index
    %0 = vector.load %arg1[%c0, %c0_0] : memref<8x16xf32, #tpu.memory_space<vmem>>, vector<8x16xf32>
    %c0_1 = arith.constant 0 : index
    %c0_2 = arith.constant 0 : index
    %1 = vector.load %arg2[%c0_1, %c0_2] : memref<16x32xf32, #tpu.memory_space<vmem>>, vector<16x32xf32>
    %c0_3 = arith.constant 0 : index
    %c0_4 = arith.constant 0 : index
    %2 = vector.load %arg3[%c0_3, %c0_4] : memref<1x32xf32, #tpu.memory_space<vmem>>, vector<1x32xf32>
    %cst = arith.constant dense<0.000000e+00> : vector<8x32xf32>
    %3 = tpu.matmul %0, %1, %cst {dimension_numbers = #tpu.dot_dimension_numbers<[1], [0], [0], [1], [0, 0, 1, 1], [], []>, precision = #tpu.contract_precision<fp32>} : vector<8x16xf32>, vector<16x32xf32>, vector<8x32xf32> -> vector<8x32xf32>
    %4 = vector.broadcast %2 : vector<1x32xf32> to vector<8x32xf32>
    %5 = arith.addf %3, %4 : vector<8x32xf32>
    %cst_5 = arith.constant 0.000000e+00 : f32
    %6 = vector.broadcast %cst_5 : f32 to vector<8x32xf32>
    %7 = arith.maximumf %5, %6 : vector<8x32xf32>
    %c0_6 = arith.constant 0 : index
    %c0_7 = arith.constant 0 : index
    %8 = vector.load %arg4[%c0_6, %c0_7] : memref<32x32xf32, #tpu.memory_space<vmem>>, vector<32x32xf32>
    %c0_8 = arith.constant 0 : index
    %c0_9 = arith.constant 0 : index
    %9 = vector.load %arg5[%c0_8, %c0_9] : memref<1x32xf32, #tpu.memory_space<vmem>>, vector<1x32xf32>
    %cst_10 = arith.constant dense<0.000000e+00> : vector<8x32xf32>
    %10 = tpu.matmul %7, %8, %cst_10 {dimension_numbers = #tpu.dot_dimension_numbers<[1], [0], [0], [1], [0, 0, 1, 1], [], []>, precision = #tpu.contract_precision<fp32>} : vector<8x32xf32>, vector<32x32xf32>, vector<8x32xf32> -> vector<8x32xf32>
    %11 = vector.broadcast %9 : vector<1x32xf32> to vector<8x32xf32>
    %12 = arith.addf %10, %11 : vector<8x32xf32>
    %cst_11 = arith.constant 0.000000e+00 : f32
    %13 = vector.broadcast %cst_11 : f32 to vector<8x32xf32>
    %14 = arith.maximumf %12, %13 : vector<8x32xf32>
    %c0_12 = arith.constant 0 : index
    %c0_13 = arith.constant 0 : index
    %15 = vector.load %arg6[%c0_12, %c0_13] : memref<1x32xf32, #tpu.memory_space<vmem>>, vector<1x32xf32>
    %16 = tpu.transpose %14, [1, 0] : vector<8x32xf32> -> vector<32x8xf32>
    %cst_14 = arith.constant dense<0.000000e+00> : vector<1x8xf32>
    %17 = tpu.matmul %15, %16, %cst_14 {dimension_numbers = #tpu.dot_dimension_numbers<[1], [0], [0], [1], [0, 0, 1, 1], [], []>, precision = #tpu.contract_precision<fp32>} : vector<1x32xf32>, vector<32x8xf32>, vector<1x8xf32> -> vector<1x8xf32>
    %c0_15 = arith.constant 0 : index
    %c0_16 = arith.constant 0 : index
    %18 = memref.load %arg7[%c0_15, %c0_16] : memref<1x1xf32, #tpu.memory_space<smem>>
    %19 = vector.broadcast %18 : f32 to vector<1x8xf32>
    %20 = arith.addf %17, %19 : vector<1x8xf32>
    %c0_17 = arith.constant 0 : index
    %c0_18 = arith.constant 0 : index
    %21 = vector.load %arg8[%c0_17, %c0_18] : memref<1x8xf32, #tpu.memory_space<vmem>>, vector<1x8xf32>
    tpu.vector_store %arg8[%c0_17, %c0_18], %20 {strides = array<i32>} : memref<1x8xf32, #tpu.memory_space<vmem>>, vector<1x8xf32>,
    return
  }
  func.func @transform_0(%arg0: i32) -> (i32, i32) {
    %c0_i32 = arith.constant 0 : i32
    %c0_i32_0 = arith.constant 0 : i32
    return %arg0, %c0_i32 : i32, i32
  }
  func.func @transform_1(%arg0: i32) -> (i32, i32) {
    %c0_i32 = arith.constant 0 : i32
    %c0_i32_0 = arith.constant 0 : i32
    %c0_i32_1 = arith.constant 0 : i32
    return %c0_i32, %c0_i32_0 : i32, i32
  }
  func.func @transform_2(%arg0: i32) -> (i32, i32) {
    %c0_i32 = arith.constant 0 : i32
    %c0_i32_0 = arith.constant 0 : i32
    %c0_i32_1 = arith.constant 0 : i32
    return %c0_i32, %c0_i32_0 : i32, i32
  }
  func.func @transform_3(%arg0: i32) -> (i32, i32) {
    %c0_i32 = arith.constant 0 : i32
    %c0_i32_0 = arith.constant 0 : i32
    %c0_i32_1 = arith.constant 0 : i32
    return %c0_i32, %c0_i32_0 : i32, i32
  }
  func.func @transform_4(%arg0: i32) -> (i32, i32) {
    %c0_i32 = arith.constant 0 : i32
    %c0_i32_0 = arith.constant 0 : i32
    %c0_i32_1 = arith.constant 0 : i32
    return %c0_i32, %c0_i32_0 : i32, i32
  }
  func.func @transform_5(%arg0: i32) -> (i32, i32) {
    %c0_i32 = arith.constant 0 : i32
    %c0_i32_0 = arith.constant 0 : i32
    %c0_i32_1 = arith.constant 0 : i32
    return %c0_i32, %c0_i32_0 : i32, i32
  }
  func.func @transform_6(%arg0: i32) -> (i32, i32) {
    %c0_i32 = arith.constant 0 : i32
    %c0_i32_0 = arith.constant 0 : i32
    %c0_i32_1 = arith.constant 0 : i32
    return %c0_i32, %c0_i32_0 : i32, i32
  }
  func.func @transform_7(%arg0: i32) -> (i32, i32) {
    %c0_i32 = arith.constant 0 : i32
    %c0_i32_0 = arith.constant 0 : i32
    return %arg0, %c0_i32 : i32, i32
  }
}

</mosaic_0001>

<bundles_post_ra>
// kernel: tpu_custom_call.1
= control target key start
LH: loop header
LB: loop body
LE: loop exit
PB: predicated region body
PF: predicated region fallthrough
CT: control target
= control target key end

     0   :  { %13 = vsyncpa [#allocation4], 0  ;;  %s2088_s0 = inlined_call_operand.hbm [shape: f32[8,16], index: 0, kind: input, shape index: {}]   ;;  %s2089_s1 = inlined_call_operand.hbm [shape: f32[16,32], index: 1, kind: input, shape index: {}]   ;;  %s2090_s2 = inlined_call_operand.vmem [shape: f32[1,32], index: 2, kind: input, shape index: {}]   ;;  %s2091_s3 = inlined_call_operand.hbm [shape: f32[32,32], index: 3, kind: input, shape index: {}]   ;;  %s2092_s4 = inlined_call_operand.vmem [shape: f32[1,32], index: 4, kind: input, shape index: {}]   ;;  %s2093_s5 = inlined_call_operand.vmem [shape: f32[1,32], index: 5, kind: input, shape index: {}]   ;;  %s2094_s6 = inlined_call_operand.<no memory space> [shape: f32[1,1], index: 6, kind: input, shape index: {}]   ;;  %s2095_s7 = inlined_call_operand.hbm [shape: f32[1,8], index: 7, kind: output, shape index: {}]  }
   0x1   :  { %14 = vsyncpa [#allocation7], 0 }
   0x2   :  { %15 = vsyncpa [#allocation5], 0  ;;  %s1905_s24 = smov [#allocation6]   ;;  %s1811_s28 = scalar_lea.hbm %s2089_s1, 256 }
   0x3   :  { %s31_s25 = sshll.u32 %s1905_s24, 4  ;;  %p1812_p0 = scmp.ne.s32.totalorder %s2089_s1, %s1811_s28  ;;  %s32_s25 = int_to_ptr.vmem [resolvable:$true] %s31_s25 }
   0x4   :  { %p1815_p1 = scmp.lt.u32.totalorder %s1811_s28, %s2089_s1 }
   0x6   :  { %p1817_p2 = pnand %p1815_p1, %p1812_p0 }
   0x8   :  { %1820 = shalt.err (!%p1817_p2)
}
   0x9   :  { %s1821_s10 = scalar_lea.vmem %s32_s25, 256  ;;  %p1826_p4 = scmp.lt.s32.totalorder %s32_s25, %s32_s25 }
   0xa   :  { %p1822_p3 = scmp.ne.s32.totalorder %s32_s25, %s1821_s10  ;;  %p1827_p5 = scmp.lt.s32.totalorder %s1821_s10, %s1821_s10 }
   0xc   :  { %p1828_p6 = por %p1827_p5, %p1826_p4 }
   0xe   :  { %p1829_p7 = pnand %p1828_p6, %p1822_p3 }
  0x10   :  { %1832 = shalt.err (!%p1829_p7)
}
  0x11   :  { %s1906_s11 = smov 128   ;;  %s1907_s12 = smov 8  }
  0x12   :  { %37 = dma.hbm_to_vmem [thread:$0]  %s2089_s1, 256, %s32_s25, [#allocation7], %s1906_s11, %s1906_s11, %s1907_s12  }
  0x13   :  { %s1908_s15 = smov [#allocation3]   ;;  %s1909_s17 = smov [#allocation8]  }
  0x14   :  { %s22_s16 = sshll.u32 %s1908_s15, 4  ;;  %s45_s18 = sshll.u32 %s1909_s17, 4  ;;  %s23_s16 = int_to_ptr.vmem [resolvable:$true] %s22_s16  ;;  %s46_s18 = int_to_ptr.vmem [resolvable:$true] %s45_s18 }
  0x15   :  { %s1833_s21 = scalar_lea.hbm %s2088_s0, 128 }
  0x16   :  { %p1834_p8 = scmp.ne.s32.totalorder %s2088_s0, %s1833_s21  ;;  %p1837_p9 = scmp.lt.u32.totalorder %s1833_s21, %s2088_s0 }
  0x18   :  { %p1839_p10 = pnand %p1837_p9, %p1834_p8 }
  0x1a   :  { %1842 = shalt.err (!%p1839_p10)
}
  0x1b   :  { %s1843_s1 = scalar_lea.vmem %s23_s16, 128  ;;  %p1848_p12 = scmp.lt.s32.totalorder %s23_s16, %s23_s16 }
  0x1c   :  { %p1844_p11 = scmp.ne.s32.totalorder %s23_s16, %s1843_s1  ;;  %p1849_p13 = scmp.lt.s32.totalorder %s1843_s1, %s1843_s1 }
  0x1e   :  { %p1850_p0 = por %p1849_p13, %p1848_p12 }
  0x20   :  { %p1851_p1 = pnand %p1850_p0, %p1844_p11 }
  0x22   :  { %1854 = shalt.err (!%p1851_p1)
}
  0x23   :  { %25 = dma.hbm_to_vmem [thread:$0]  %s2088_s0, 128, %s23_s16, [#allocation4]  }
  0x24   :  { %s1855_s30 = scalar_lea.hbm %s2091_s3, 512 }
  0x25   :  { %p1856_p2 = scmp.ne.s32.totalorder %s2091_s3, %s1855_s30  ;;  %p1859_p3 = scmp.lt.u32.totalorder %s1855_s30, %s2091_s3 }
  0x27   :  { %p1861_p4 = pnand %p1859_p3, %p1856_p2 }
  0x29   :  { %1864 = shalt.err (!%p1861_p4)
}
  0x2a   :  { %s1865_s14 = scalar_lea.vmem %s46_s18, 512  ;;  %p1870_p6 = scmp.lt.s32.totalorder %s46_s18, %s46_s18 }
  0x2b   :  { %p1866_p5 = scmp.ne.s32.totalorder %s46_s18, %s1865_s14  ;;  %p1871_p7 = scmp.lt.s32.totalorder %s1865_s14, %s1865_s14 }
  0x2d   :  { %p1872_p8 = por %p1871_p7, %p1870_p6 }
  0x2f   :  { %p1873_p9 = pnand %p1872_p8, %p1866_p5 }
  0x31   :  { %1876 = shalt.err (!%p1873_p9)
}
  0x32   :  { %51 = dma.hbm_to_vmem [thread:$0]  %s2091_s3, 512, %s46_s18, [#allocation7], %s1906_s11, %s1906_s11, %s1907_s12  }
  0x33   :  { %1899 = dma.done.wait [#allocation4], 128  }
  0x34   :  { %1900 = vsyncadd [#allocation4], 4294967168 }
  0x35   :  { %1901 = dma.done.wait [#allocation7], 768  }
  0x36   :  { %1902 = vsyncadd [#allocation7], 4294966528  ;;  %v1910_v0 = vmov 0.0|0.0   ;;  %vm1911_vm0 = vmmov 0   ;;  %v1912_v1 = vmov 0.0   ;;  %vm77_vm1 = vcmask 130048  }
  0x37   :  { %1715 = vmatprep.subr.bf16.mxu0 %v1910_v0  ;;  %1581 = vmatprep.mubr.msk.f32.mxu0 %vm1911_vm0, %v1912_v1  ;;  %v68_v2 = vld [vmem:[#allocation6] sm:$0xff]  ;;  %v69_v3 = vld [vmem:[#allocation6 + $0x8] sm:$0xff]  ;;  %v67_v4 = vld [vmem:[#allocation3] sm:$0xff]  ;;  %vm552_vm2 = vcmask 261120   ;;  %s1913_s18 = smov [#allocation9]   ;;  %vm1497_vm3 = vcmask 57344  }
  0x38   :  { %1733 = vmatprep.subr.bf16.mxu1 %v1910_v0  ;;  %1627 = vmatprep.mubr.msk.f32.mxu1 %vm1911_vm0, %v1912_v1  ;;  %v82_v5 = vand.u32 4294901760, %v68_v2  ;;  %v85_v6 = vand.u32 4294901760, %v69_v3  ;;  %v79_v7 = vsel %vm77_vm1, %v67_v4, 0  ;;  %v541_v25 = vld [vmem:[#allocation8] sm:$0xff]  ;;  %v542_v26 = vld [vmem:[#allocation8 + $0x8] sm:$0xff]  ;;  %v543_v32 = vld [vmem:[#allocation8 + $0x10] sm:$0xff] }
  0x39   :  { %v148_v8 = vand.u32 4294901760, %v79_v7  ;;  %v557_v27 = vand.u32 4294901760, %v541_v25  ;;  %v560_v28 = vand.u32 4294901760, %v542_v26  ;;  %v544_v33 = vld [vmem:[#allocation8 + $0x18] sm:$0xff]  ;;  %v563_v34 = vand.u32 4294901760, %v543_v32  ;;  %s1505_s19 = sshll.u32 %s1913_s18, 4  ;;  %s1506_s19 = int_to_ptr.vmem [resolvable:$true] %s1505_s19 }
  0x3a   :  { %v1716_v9 = vpack.c.bf16 %v85_v6, %v82_v5  ;;  %v160_v10 = vsub.f32 %v68_v2, %v82_v5  ;;  %v167_v11 = vsub.f32 %v69_v3, %v85_v6  ;;  %v566_v35 = vand.u32 4294901760, %v544_v33  ;;  %v1515_v57 = vld [vmem:[%s2090_s2] ss:$0 sm:$0xff]  ;;  %s1877_s20 = scalar_lea.vmem %s1506_s19, 16  ;;  %s1881_s21 = scalar_lea.vmem %s1506_s19, 32 }
  0x3b   :  { %v149_v12 = vsub.f32 %v79_v7, %v148_v8  ;;  %v2020_v29 = vpack.c.bf16 %v560_v28, %v557_v27  ;;  %v637_v30 = vsub.f32 %v541_v25, %v557_v27  ;;  %v644_v31 = vsub.f32 %v542_v26, %v560_v28  ;;  %v1042_v6 = vld [vmem:[%s2093_s5] sm:$0x1]  ;;  %p1878_p10 = scmp.ne.s32.totalorder %s1506_s19, %s1877_s20  ;;  %p1882_p11 = scmp.lt.s32.totalorder %s1506_s19, %s1506_s19 }
  0x3c   :  { %1717 = vmatpush3.bf16.msra.mxu0 %v1716_v9  ;;  %v161_v13 = vand.u32 4294901760, %v160_v10  ;;  %v168_v14 = vand.u32 4294901760, %v167_v11  ;;  %v1722_v23 = vpack.c.bf16 %v167_v11, %v160_v10  ;;  %v1737_v38 = vpack.c.bf16 %v566_v35, %v563_v34  ;;  %p1883_p12 = scmp.lt.s32.totalorder %s1881_s21, %s1877_s20 }
  0x3d   :  { %v150_v15 = vand.u32 4294901760, %v149_v12  ;;  %1718 = vmatprep.subr.bf16.mxu0 %v1910_v0  ;;  %1735 = vmatpush3.bf16.msra.mxu1 %v2020_v29  ;;  %v638_v36 = vand.u32 4294901760, %v637_v30  ;;  %v645_v37 = vand.u32 4294901760, %v644_v31  ;;  %v651_v39 = vsub.f32 %v543_v32, %v563_v34 }
  0x3e   :  { %v162_v16 = vsub.f32 %v160_v10, %v161_v13  ;;  %v169_v17 = vsub.f32 %v167_v11, %v168_v14  ;;  %v1728_v24 = vpack.c.bf16 %v168_v14, %v161_v13  ;;  %1736 = vmatprep.subr.bf16.mxu1 %v1910_v0  ;;  %v658_v40 = vsub.f32 %v544_v33, %v566_v35  ;;  %v1516_v10 = vld [vmem:[%s2092_s4] ss:$0 sm:$0xff]  ;;  %p1884_p13 = por %p1883_p12, %p1882_p11 }
  0x3f   :  { %v151_v18 = vsub.f32 %v149_v12, %v150_v15  ;;  %v639_v41 = vsub.f32 %v637_v30, %v638_v36  ;;  %v646_v42 = vsub.f32 %v644_v31, %v645_v37  ;;  %v652_v44 = vand.u32 4294901760, %v651_v39 }
  0x40   :  { %v163_v19 = vand.u32 4294901760, %v162_v16  ;;  %v170_v20 = vand.u32 4294901760, %v169_v17  ;;  %v659_v45 = vand.u32 4294901760, %v658_v40  ;;  %v1746_v53 = vpack.c.bf16 %v644_v31, %v637_v30  ;;  %p1885_p0 = pnand %p1884_p13, %p1878_p10 }
  0x41   :  { %v152_v21 = vand.u32 4294901760, %v151_v18  ;;  %1738 = vmatpush3.bf16.msra.mxu1 %v1737_v38  ;;  %v640_v43 = vand.u32 4294901760, %v639_v41  ;;  %v647_v46 = vand.u32 4294901760, %v646_v42  ;;  %v653_v47 = vsub.f32 %v651_v39, %v652_v44 }
  0x42   :  { %v1719_v22 = vpack.c.bf16 %v170_v20, %v163_v19  ;;  %1739 = vmatprep.subr.bf16.mxu1 %v1910_v0  ;;  %v660_v48 = vsub.f32 %v658_v40, %v659_v45  ;;  %v1749_v54 = vpack.c.bf16 %v658_v40, %v651_v39  ;;  %v1758_v55 = vpack.c.bf16 %v645_v37, %v638_v36 }
  0x43   :  { %1582 = vmatmul.mubr.f32.vlgmr.msra.gmra.mrb[0].mxu0 %v152_v21  ;;  %v1740_v49 = vpack.c.bf16 %v647_v46, %v640_v43  ;;  %v654_v50 = vand.u32 4294901760, %v653_v47  ;;  %v1761_v56 = vpack.c.bf16 %v659_v45, %v652_v44  ;;  %v1046_v7 = vsel %vm552_vm2, %v1042_v6, 0 }
  0x44   :  { %1720 = vmatpush3.bf16.msra.mxu0 %v1719_v22  ;;  %1588 = vmatprep.mubr.msk.f32.mxu0 %vm1911_vm0, %v1912_v1  ;;  %v661_v51 = vand.u32 4294901760, %v660_v48 }
  0x45   :  { %1721 = vmatprep.subr.bf16.mxu0 %v1910_v0 }
  0x46   :  { %v1743_v52 = vpack.c.bf16 %v661_v51, %v654_v50 }
  0x4b   :  { %1589 = vmatmul.mubr.f32.vlgmr.msra.gmra.mrb[0].mxu0 %v148_v8 }
  0x4c   :  { %1723 = vmatpush3.bf16.msra.mxu0 %v1722_v23  ;;  %1595 = vmatprep.mubr.msk.f32.mxu0 %vm1911_vm0, %v1912_v1  ;;  %v1044_v23 = vstv %s2094_s6 }
  0x4d   :  { %1724 = vmatprep.subr.bf16.mxu0 %v1910_v0 }
  0x53   :  { %1596 = vmatmul.mubr.f32.vlgmr.msra.gmra.mrb[0].mxu0 %v149_v12 }
  0x54   :  { %1726 = vmatpush3.bf16.msra.mxu0 %v1716_v9  ;;  %1602 = vmatprep.mubr.msk.f32.mxu0 %vm1911_vm0, %v1912_v1 }
  0x55   :  { %1727 = vmatprep.subr.bf16.mxu0 %v1910_v0 }
  0x5b   :  { %1603 = vmatmul.mubr.f32.vlgmr.msra.gmra.mrb[0].mxu0 %v150_v15 }
  0x5c   :  { %1729 = vmatpush3.bf16.msra.mxu0 %v1728_v24  ;;  %1609 = vmatprep.mubr.msk.f32.mxu0 %vm1911_vm0, %v1912_v1 }
  0x5d   :  { %1730 = vmatprep.subr.bf16.mxu0 %v1910_v0 }
  0x63   :  { %1610 = vmatmul.mubr.f32.vlgmr.msra.gmra.mrb[0].mxu0 %v148_v8 }
  0x64   :  { %1732 = vmatpush3.bf16.msra.mxu0 %v1716_v9  ;;  %1616 = vmatprep.mubr.msk.f32.mxu0 %vm1911_vm0, %v1912_v1 }
  0x65   :  { %1685 = vmatprep.subr.mxu0 %v1912_v1 }
  0x6b   :  { %1617 = vmatmul.mubr.f32.vlgmr.msra.gmra.mrb[0].mxu0 %v148_v8  ;;  %v1117_v8 = vand.u32 4294901760, %v1046_v7 }
  0x6c   :  { %1687 = vmatprep.mubr.msk.f32.mxu0 %vm1911_vm0, %v1912_v1 }
  0x6d   :  { %v1118_v9 = vsub.f32 %v1046_v7, %v1117_v8 }
  0x6f   :  { %v1119_v11 = vand.u32 4294901760, %v1118_v9 }
 0x13e   :  { %v536_v58 = vpop.f32.mrb[0].mxu0 }
 0x13f   :  { %v1769_v59 = vadd.f32 %v1515_v57, %v536_v58  ;;  %v1618_v60 = vpop.f32.mrb[1].mxu0 }
 0x141   :  { %v540_v61 = vmax.f32 %v1769_v59, 0.0 }
 0x143   :  { %v554_v62 = vsel %vm552_vm2, %v540_v61, 0 }
 0x144   :  { %v625_v63 = vand.u32 4294901760, %v554_v62 }
 0x146   :  { %v626_v2 = vsub.f32 %v554_v62, %v625_v63 }
 0x148   :  { %v627_v3 = vand.u32 4294901760, %v626_v2 }
 0x14a   :  { %v628_v4 = vsub.f32 %v626_v2, %v627_v3 }
 0x14c   :  { %v629_v5 = vand.u32 4294901760, %v628_v4 }
 0x14e   :  { %1628 = vmatmul.mubr.f32.vlgmr.msra.gmra.mrb[0].mxu1 %v629_v5 }
 0x14f   :  { %1741 = vmatpush3.bf16.msra.mxu1 %v1740_v49  ;;  %1638 = vmatprep.mubr.msk.f32.mxu1 %vm1911_vm0, %v1912_v1 }
 0x150   :  { %1742 = vmatprep.subr.bf16.mxu1 %v1910_v0 }
 0x153   :  { %1744 = vmatpush3.bf16.msra.mxu1 %v1743_v52 }
 0x154   :  { %1745 = vmatprep.subr.bf16.mxu1 %v1910_v0 }
 0x156   :  { %1639 = vmatmul.mubr.f32.vlgmr.msra.gmra.mrb[0].mxu1 %v625_v63 }
 0x157   :  { %1747 = vmatpush3.bf16.msra.mxu1 %v1746_v53  ;;  %1649 = vmatprep.mubr.msk.f32.mxu1 %vm1911_vm0, %v1912_v1 }
 0x158   :  { %1748 = vmatprep.subr.bf16.mxu1 %v1910_v0 }
 0x15b   :  { %1750 = vmatpush3.bf16.msra.mxu1 %v1749_v54 }
 0x15c   :  { %1751 = vmatprep.subr.bf16.mxu1 %v1910_v0 }
 0x15e   :  { %1650 = vmatmul.mubr.f32.vlgmr.msra.gmra.mrb[0].mxu1 %v626_v2 }
 0x15f   :  { %1753 = vmatpush3.bf16.msra.mxu1 %v2020_v29  ;;  %1660 = vmatprep.mubr.msk.f32.mxu1 %vm1911_vm0, %v1912_v1 }
 0x160   :  { %1754 = vmatprep.subr.bf16.mxu1 %v1910_v0 }
 0x163   :  { %1756 = vmatpush3.bf16.msra.mxu1 %v1737_v38 }
 0x164   :  { %1757 = vmatprep.subr.bf16.mxu1 %v1910_v0 }
 0x166   :  { %1661 = vmatmul.mubr.f32.vlgmr.msra.gmra.mrb[0].mxu1 %v627_v3 }
 0x167   :  { %1759 = vmatpush3.bf16.msra.mxu1 %v1758_v55  ;;  %1671 = vmatprep.mubr.msk.f32.mxu1 %vm1911_vm0, %v1912_v1 }
 0x168   :  { %1760 = vmatprep.subr.bf16.mxu1 %v1910_v0 }
 0x16b   :  { %1762 = vmatpush3.bf16.msra.mxu1 %v1761_v56 }
 0x16c   :  { %1763 = vmatprep.subr.bf16.mxu1 %v1910_v0 }
 0x16e   :  { %1672 = vmatmul.mubr.f32.vlgmr.msra.gmra.mrb[0].mxu1 %v625_v63 }
 0x16f   :  { %1765 = vmatpush3.bf16.msra.mxu1 %v2020_v29  ;;  %1682 = vmatprep.mubr.msk.f32.mxu1 %vm1911_vm0, %v1912_v1 }
 0x170   :  { %1766 = vmatprep.subr.bf16.mxu1 %v1910_v0  ;;  %v1120_v0 = vsub.f32 %v1118_v9, %v1119_v11 }
 0x172   :  { %v1121_v18 = vand.u32 4294901760, %v1120_v0 }
 0x173   :  { %1768 = vmatpush3.bf16.msra.mxu1 %v1737_v38 }
 0x176   :  { %1683 = vmatmul.mubr.f32.vlgmr.msra.gmra.mrb[0].mxu1 %v625_v63 }
 0x249   :  { %v1037_v12 = vpop.f32.mrb[0].mxu1 }
 0x24a   :  { %v1770_v13 = vadd.f32 %v1516_v10, %v1037_v12  ;;  %v1684_v14 = vpop.f32.mrb[1].mxu1 }
 0x24c   :  { %v1041_v15 = vmax.f32 %v1770_v13, 0.0 }
 0x24e   :  { %v1049_v16 = vsel %vm552_vm2, %v1041_v15, 0 }
 0x24f   :  { %v1052_v17 = vand.u32 4294901760, %v1049_v16 }
 0x251   :  { %v1129_v19 = vsub.f32 %v1049_v16, %v1052_v17  ;;  %1686 = vmatpush3.xpose.msra.mxu0 %v1052_v17 }
 0x252   :  { %1690 = vmatprep.subr.mxu0 %v1912_v1 }
 0x253   :  { %v1130_v20 = vand.u32 4294901760, %v1129_v19 }
 0x254   :  { %1688 = vmatmul.mubr.f32.vlgmr.msra.gmra.mrb[2].mxu0 %v1121_v18 }
 0x255   :  { %v1131_v21 = vsub.f32 %v1129_v19, %v1130_v20  ;;  %1692 = vmatprep.mubr.msk.f32.mxu0 %vm1911_vm0, %v1912_v1 }
 0x257   :  { %v1132_v22 = vand.u32 4294901760, %v1131_v21 }
 0x259   :  { %1691 = vmatpush3.xpose.msra.mxu0 %v1132_v22 }
 0x25a   :  { %1695 = vmatprep.subr.mxu0 %v1912_v1 }
 0x25c   :  { %1693 = vmatmul.mubr.f32.vlgmr.msra.gmra.mrb[2].mxu0 %v1117_v8 }
 0x25d   :  { %1696 = vmatpush3.xpose.msra.mxu0 %v1129_v19  ;;  %1697 = vmatprep.mubr.msk.f32.mxu0 %vm1911_vm0, %v1912_v1 }
 0x25e   :  { %1700 = vmatprep.subr.mxu0 %v1912_v1 }
 0x264   :  { %1698 = vmatmul.mubr.f32.vlgmr.msra.gmra.mrb[2].mxu0 %v1118_v9 }
 0x265   :  { %1701 = vmatpush3.xpose.msra.mxu0 %v1052_v17  ;;  %1702 = vmatprep.mubr.msk.f32.mxu0 %vm1911_vm0, %v1912_v1 }
 0x266   :  { %1705 = vmatprep.subr.mxu0 %v1912_v1 }
 0x26c   :  { %1703 = vmatmul.mubr.f32.vlgmr.msra.gmra.mrb[2].mxu0 %v1119_v11 }
 0x26d   :  { %1706 = vmatpush3.xpose.msra.mxu0 %v1130_v20  ;;  %1707 = vmatprep.mubr.msk.f32.mxu0 %vm1911_vm0, %v1912_v1 }
 0x26e   :  { %1710 = vmatprep.subr.mxu0 %v1912_v1 }
 0x274   :  { %1708 = vmatmul.mubr.f32.vlgmr.msra.gmra.mrb[2].mxu0 %v1117_v8 }
 0x275   :  { %1711 = vmatpush3.xpose.msra.mxu0 %v1052_v17  ;;  %1712 = vmatprep.mubr.msk.f32.mxu0 %vm1911_vm0, %v1912_v1 }
 0x27c   :  { %1713 = vmatmul.mubr.f32.vlgmr.msra.gmra.mrb[2].mxu0 %v1117_v8 }
 0x34f   :  { %v1493_v24 = vpop.f32.mrb[2].mxu0 }
 0x350   :  { %v1771_v25 = vadd.f32 %v1493_v24, %v1044_v23  ;;  %v1714_v26 = vpop.f32.mrb[3].mxu0 }
 0x352   :  { %1498 = vst.msk [vmem:[#allocation9] sm:$0x1] %vm1497_vm3, %v1771_v25 }
 0x353   :  { %1888 = shalt.err (!%p1885_p0)
}
 0x354   :  { %s1889_s6 = scalar_lea.hbm %s2095_s7, 16 }
 0x355   :  { %p1890_p1 = scmp.ne.s32.totalorder %s2095_s7, %s1889_s6  ;;  %p1893_p2 = scmp.lt.u32.totalorder %s1889_s6, %s2095_s7 }
 0x357   :  { %p1895_p3 = pnand %p1893_p2, %p1890_p1 }
 0x359   :  { %1898 = shalt.err (!%p1895_p3)
}
 0x35a   :  { %1508 = dma.vmem_to_hbm [thread:$0]  %s1506_s19, 16, %s2095_s7, [#allocation5]  }
 0x35b   :  { %1903 = dma.done.wait [#allocation5], 16  }
 0x35c   :  { %1904 = vsyncadd [#allocation5], 4294967280 }
 0x35d   :  { %1512 = vsyncpa [#allocation4], 1 }
 0x35e   :  { %1513 = vsyncpa [#allocation7], 1 }
 0x35f   :  { %1514 = vsyncpa [#allocation5], 1 }

</bundles_post_ra>
